<compile_context>
chip_gen: v7x
topology: tpu7x:2x2x1
jax: 0.10.0
libtpu: 0.0.40
codegen_flags: <defaults>
</compile_context>

<pallas_src>
import functools

import jax
import jax.numpy as jnp
from jax import lax
from jax.experimental import pallas as pl
from jax.experimental.pallas import tpu as pltpu
import numpy as np


def _round_up(x, m):
    return ((x + m - 1) // m) * m


def _plan_rows(n_patches, batch, cap):
    """Pick (N_pad, TM, images_per_tile).

    images_per_tile > 0  -> each grid tile spans that many whole images
                            (pos table is host-tiled to TM rows, constant add).
    images_per_tile == 0 -> sub-image tiles with TM | N_pad (pos table stays
                            (N_pad, E) resident and is sliced in-kernel).
    """
    n_pad = _round_up(n_patches, 16)            # bf16-friendly sublane pairs
    if n_pad <= cap:
        ks = [k for k in range(1, batch + 1) if batch % k == 0 and k * n_pad <= cap]
        k = max(ks)
        if batch // k < 2:                      # prefer >=2 tiles (megacore) ...
            alt = [k2 for k2 in ks if batch // k2 >= 2 and k2 * n_pad >= 128]
            if alt:                             # ... unless tiles drop below 128 rows
                k = max(alt)
        return n_pad, k * n_pad, k
    # Sub-image tiling: largest multiple-of-16 tile <= cap that divides N_pad.
    tm = 16
    for t in range(16, cap + 1, 16):
        if n_pad % t == 0:
            tm = t
    if tm < 128:                                # no good divisor: re-pad to a clean tile
        tm = min(256, cap)
        n_pad = _round_up(n_patches, tm)
    return n_pad, tm, 0


def _patch_embed_kernel(p_ref, w_ref, pos_ref, o_ref, *, tm, pos_blocks):
    # p_ref:   (TM, K_pad)        patches tile (compute dtype, e.g. bf16)
    # w_ref:   (K_pad, E)         weight (K,E), grid-invariant, Buffered(1)
    # pos_ref: (TM or N_pad, E)   positions[1:] + conv bias, f32, resident
    # o_ref:   (TM, E)
    acc = jnp.dot(p_ref[...], w_ref[...], preferred_element_type=jnp.float32)
    if pos_blocks == 1:
        pos = pos_ref[...]
    else:
        start = pl.multiple_of((pl.program_id(0) % pos_blocks) * tm, tm)
        pos = pos_ref[pl.ds(start, tm), :]
    # Single fused epilogue add in f32; downcast only at the store.
    o_ref[...] = (acc + pos).astype(o_ref.dtype)


@functools.partial(
    jax.jit,
    static_argnames=("patch_size", "compute_dtype", "out_dtype", "row_tile_cap"))
def patch_embedding(x, weight, bias, cls_token, positions, *, patch_size,
                    compute_dtype=jnp.bfloat16, out_dtype=None, row_tile_cap=512):
    """x: (B, C, H, W) NCHW.  Returns (B, (H//P)*(W//P) + 1, E) like the PyTorch module."""
    B, C, H, W = x.shape
    P = patch_size
    nH, nW = H // P, W // P
    N = nH * nW
    E = weight.shape[0]
    K = C * P * P
    out_dtype = x.dtype if out_dtype is None else out_dtype

    K_pad = _round_up(K, 128)                       # lane-aligned contraction dim
    N_pad, TM, images_per_tile = _plan_rows(N, B, row_tile_cap)
    M = B * N_pad
    m_tiles = M // TM
    pos_blocks = 1 if images_per_tile > 0 else N_pad // TM

    # --- host glue (fused under jit into ~one pass producing bf16 padded patches):
    # unfold NCHW into (M, K_pad); feature order (C, P, P) matches OIHW flattening.
    patches = (x.astype(compute_dtype)
               .reshape(B, C, nH, P, nW, P)
               .transpose(0, 2, 4, 1, 3, 5)
               .reshape(B, N, K))
    patches = jnp.pad(patches, ((0, 0), (0, N_pad - N), (0, K_pad - K)))
    patches_flat = patches.reshape(M, K_pad)

    # One-time host transpose of the tiny weight to (K_pad, E): plain NN matmul.
    w_kn = jnp.pad(weight.reshape(E, K).T.astype(compute_dtype),
                   ((0, K_pad - K), (0, 0)))

    # positions[1:] + conv bias, f32, zero-padded rows; fully VMEM-resident.
    pos_bias = (positions[1:N + 1].astype(jnp.float32)
                + bias.astype(jnp.float32)[None, :])
    pos_bias = jnp.pad(pos_bias, ((0, N_pad - N), (0, 0)))
    if images_per_tile > 1:
        pos_table = jnp.tile(pos_bias, (images_per_tile, 1))   # (TM, E)
    else:
        pos_table = pos_bias                                    # (TM, E) or (N_pad, E)
    pos_rows = pos_table.shape[0]

    # VMEM limit from actual footprint (not a blanket 48 MiB).
    cd = jnp.dtype(compute_dtype).itemsize
    od = jnp.dtype(out_dtype).itemsize
    vmem_bytes = (2 * TM * K_pad * cd      # patches tile, double buffered
                  + 1 * K_pad * E * cd     # weight, Buffered(1)
                  + 1 * pos_rows * E * 4   # pos table, Buffered(1)
                  + 2 * TM * E * od        # output tile, double buffered
                  + TM * E * 4)            # f32 accumulator
    vmem_limit = max(int(vmem_bytes * 1.5), 8 * 1024 * 1024)

    kernel = functools.partial(_patch_embed_kernel, tm=TM, pos_blocks=pos_blocks)
    out_flat = pl.pallas_call(
        kernel,
        out_shape=jax.ShapeDtypeStruct((M, E), out_dtype),
        grid_spec=pltpu.PrefetchScalarGridSpec(
            num_scalar_prefetch=0,
            grid=(m_tiles,),
            in_specs=[
                pl.BlockSpec((TM, K_pad), lambda i: (i, 0)),              # patches tile
                pl.BlockSpec((K_pad, E), lambda i: (0, 0),                # weight, resident
                             pipeline_mode=pl.Buffered(1)),
                pl.BlockSpec((pos_rows, E), lambda i: (0, 0),             # pos+bias, resident
                             pipeline_mode=pl.Buffered(1)),
            ],
            out_specs=pl.BlockSpec((TM, E), lambda i: (i, 0)),
        ),
        compiler_params=pltpu.CompilerParams(
            dimension_semantics=("parallel",),      # v7x: split M tiles across both TCs
            vmem_limit_bytes=vmem_limit,
        ),
    )(patches_flat, w_kn, pos_table)

    proj = out_flat.reshape(B, N_pad, E)[:, :N, :]

    # cls row in plain JAX: cls_token + positions[0], broadcast over batch (B*E elems).
    cls_row = (cls_token.reshape(1, 1, E).astype(jnp.float32)
               + positions[0].astype(jnp.float32)[None, None, :]).astype(out_dtype)
    cls_rows = jnp.broadcast_to(cls_row, (B, 1, E))
    return jnp.concatenate([cls_rows, proj], axis=1)


def _reference(x, weight, bias, cls_token, positions, patch_size):
    """Pure-JAX f32 reference matching the PyTorch module semantics."""
    B = x.shape[0]
    E = weight.shape[0]
    y = lax.conv_general_dilated(
        x, weight, window_strides=(patch_size, patch_size), padding="VALID",
        dimension_numbers=("NCHW", "OIHW", "NCHW"))            # (B, E, nH, nW)
    y = y + bias.reshape(1, E, 1, 1)
    B_, E_, nH, nW = y.shape
    y = y.reshape(B_, E_, nH * nW).transpose(0, 2, 1)          # b e (h w) -> b (h w) e
    cls = jnp.broadcast_to(cls_token, (B, 1, E))
    y = jnp.concatenate([cls, y], axis=1)
    return y + positions[None, :, :]


if __name__ == "__main__":
    # Scaled-down ViT patch embedding; emb_size=128 keeps output stores lane-dense.
    batch = 2
    in_channels = 3
    img_size = 32
    patch_size = 8
    emb_size = 128
    num_patches = (img_size // patch_size) ** 2   # 16

    key = jax.random.PRNGKey(0)
    kx, kw, kb, kc, kp = jax.random.split(key, 5)

    x = jax.random.normal(kx, (batch, in_channels, img_size, img_size), dtype=jnp.float32)
    weight = jax.random.normal(kw, (emb_size, in_channels, patch_size, patch_size),
                               dtype=jnp.float32) * 0.02
    bias = jax.random.normal(kb, (emb_size,), dtype=jnp.float32) * 0.02
    cls_token = jax.random.normal(kc, (1, 1, emb_size), dtype=jnp.float32)
    positions = jax.random.normal(kp, (num_patches + 1, emb_size), dtype=jnp.float32)

    ref = jax.block_until_ready(
        _reference(x, weight, bias, cls_token, positions, patch_size))

    # f32 MXU path: tight numerical check.
    out_f32 = jax.block_until_ready(
        patch_embedding(x, weight, bias, cls_token, positions,
                        patch_size=patch_size, compute_dtype=jnp.float32))
    assert out_f32.shape == (batch, num_patches + 1, emb_size), out_f32.shape
    np.testing.assert_allclose(np.asarray(out_f32), np.asarray(ref), rtol=1e-4, atol=1e-4)

    # bf16 MXU path (default perf path, f32 accumulate + f32 output).
    out_bf16 = jax.block_until_ready(
        patch_embedding(x, weight, bias, cls_token, positions, patch_size=patch_size))
    assert out_bf16.shape == (batch, num_patches + 1, emb_size), out_bf16.shape
    np.testing.assert_allclose(np.asarray(out_bf16), np.asarray(ref), rtol=2e-2, atol=2e-2)

    # bf16 output path (v5e write-traffic option); epilogue still f32.
    out_bf16_o = jax.block_until_ready(
        patch_embedding(x, weight, bias, cls_token, positions, patch_size=patch_size,
                        out_dtype=jnp.bfloat16))
    assert out_bf16_o.dtype == jnp.bfloat16
    np.testing.assert_allclose(np.asarray(out_bf16_o, dtype=np.float32), np.asarray(ref),
                               rtol=3e-2, atol=3e-2)

    print("KERNEL_OK")
</pallas_src>

<mosaic_0001>
module attributes {stable_mosaic.version = 11 : i64} {
  func.func @_patch_embed_kernel(%arg0: i32, %arg1: memref<32x256xf32, #tpu.memory_space<vmem>>, %arg2: memref<256x128xf32, #tpu.memory_space<vmem>>, %arg3: memref<32x128xf32, #tpu.memory_space<vmem>>, %arg4: memref<32x128xf32, #tpu.memory_space<vmem>>) attributes {dimension_semantics = [#tpu.dimension_semantics<parallel>], iteration_bounds = array<i64: 1>, scalar_prefetch = 0 : i64, scratch_operands = 0 : i64, tpu.core_type = #tpu.core_type<tc>, window_params = [{transform_indices = @transform_0, window_bounds = array<i64: 32, 256>}, {pipeline_mode = #tpu.pipeline_mode<synchronous>, transform_indices = @transform_1, window_bounds = array<i64: 256, 128>}, {pipeline_mode = #tpu.pipeline_mode<synchronous>, transform_indices = @transform_2, window_bounds = array<i64: 32, 128>}, {transform_indices = @transform_3, window_bounds = array<i64: 32, 128>}]} {
    %c0 = arith.constant 0 : index
    %c0_0 = arith.constant 0 : index
    %0 = vector.load %arg1[%c0, %c0_0] : memref<32x256xf32, #tpu.memory_space<vmem>>, vector<32x256xf32>
    %c0_1 = arith.constant 0 : index
    %c0_2 = arith.constant 0 : index
    %1 = vector.load %arg2[%c0_1, %c0_2] : memref<256x128xf32, #tpu.memory_space<vmem>>, vector<256x128xf32>
    %cst = arith.constant dense<0.000000e+00> : vector<32x128xf32>
    %2 = tpu.matmul %0, %1, %cst {dimension_numbers = #tpu.dot_dimension_numbers<[1], [0], [0], [1], [0, 0, 1, 1], [], []>} : vector<32x256xf32>, vector<256x128xf32>, vector<32x128xf32> -> vector<32x128xf32>
    %c0_3 = arith.constant 0 : index
    %c0_4 = arith.constant 0 : index
    %3 = vector.load %arg3[%c0_3, %c0_4] : memref<32x128xf32, #tpu.memory_space<vmem>>, vector<32x128xf32>
    %4 = arith.addf %2, %3 : vector<32x128xf32>
    %c0_5 = arith.constant 0 : index
    %c0_6 = arith.constant 0 : index
    %5 = vector.load %arg4[%c0_5, %c0_6] : memref<32x128xf32, #tpu.memory_space<vmem>>, vector<32x128xf32>
    tpu.vector_store %arg4[%c0_5, %c0_6], %4 {strides = array<i32>} : memref<32x128xf32, #tpu.memory_space<vmem>>, vector<32x128xf32>,
    return
  }
  func.func @transform_0(%arg0: i32) -> (i32, i32) {
    %c0_i32 = arith.constant 0 : i32
    %c0_i32_0 = arith.constant 0 : i32
    return %arg0, %c0_i32 : i32, i32
  }
  func.func @transform_1(%arg0: i32) -> (i32, i32) {
    %c0_i32 = arith.constant 0 : i32
    %c0_i32_0 = arith.constant 0 : i32
    %c0_i32_1 = arith.constant 0 : i32
    return %c0_i32, %c0_i32_0 : i32, i32
  }
  func.func @transform_2(%arg0: i32) -> (i32, i32) {
    %c0_i32 = arith.constant 0 : i32
    %c0_i32_0 = arith.constant 0 : i32
    %c0_i32_1 = arith.constant 0 : i32
    return %c0_i32, %c0_i32_0 : i32, i32
  }
  func.func @transform_3(%arg0: i32) -> (i32, i32) {
    %c0_i32 = arith.constant 0 : i32
    %c0_i32_0 = arith.constant 0 : i32
    return %arg0, %c0_i32 : i32, i32
  }
}

</mosaic_0001>

<bundles_post_ra>
// kernel: patch_embedding.1
= control target key start
LH: loop header
LB: loop body
LE: loop exit
PB: predicated region body
PF: predicated region fallthrough
CT: control target
= control target key end

     0   :  { %s407_s1 = inlined_call_operand.vmem [shape: f32[256,128], index: 1, kind: input, shape index: {}]   ;;  %s408_s0 = inlined_call_operand.vmem [shape: f32[32,256], index: 0, kind: input, shape index: {}]   ;;  %s409_s2 = inlined_call_operand.vmem [shape: f32[32,128], index: 2, kind: input, shape index: {}]   ;;  %s410_s3 = inlined_call_operand.vmem [shape: f32[32,128], index: 3, kind: output, shape index: {}]  }
   0x1   :  { %v38_v0 = vld [vmem:[%s407_s1 + $0x80] sm:$0xff]  ;;  %v39_v1 = vld [vmem:[%s407_s1 + $0x88] sm:$0xff]  ;;  %v40_v5 = vld [vmem:[%s407_s1 + $0x90] sm:$0xff] }
   0x2   :  { %v22_v2 = vld [vmem:[%s407_s1] sm:$0xff]  ;;  %v195_v3 = vpack.c.bf16 %v39_v1, %v38_v0  ;;  %v23_v4 = vld [vmem:[%s407_s1 + $0x8] sm:$0xff]  ;;  %v41_v6 = vld [vmem:[%s407_s1 + $0x98] sm:$0xff] }
   0x3   :  { %v197_v7 = vpack.c.bf16 %v23_v4, %v22_v2  ;;  %v199_v8 = vpack.c.bf16 %v41_v6, %v40_v5  ;;  %v24_v9 = vld [vmem:[%s407_s1 + $0x10] sm:$0xff]  ;;  %v25_v10 = vld [vmem:[%s407_s1 + $0x18] sm:$0xff]  ;;  %v42_v11 = vld [vmem:[%s407_s1 + $0xa0] sm:$0xff] }
   0x4   :  { %196 = vmatprep.subr.bf16.mxu0 %v195_v3  ;;  %227 = vmatprep.subr.bf16.mxu1 %v195_v3  ;;  %v43_v12 = vld [vmem:[%s407_s1 + $0xa8] sm:$0xff]  ;;  %v201_v13 = vpack.c.bf16 %v25_v10, %v24_v9  ;;  %v26_v15 = vld [vmem:[%s407_s1 + $0x20] sm:$0xff]  ;;  %v44_v17 = vld [vmem:[%s407_s1 + $0xb0] sm:$0xff] }
   0x5   :  { %198 = vmatpush3.bf16.msra.mxu0 %v197_v7  ;;  %235 = vmatpush3.bf16.msra.mxu1 %v197_v7  ;;  %v203_v14 = vpack.c.bf16 %v43_v12, %v42_v11  ;;  %v27_v16 = vld [vmem:[%s407_s1 + $0x28] sm:$0xff]  ;;  %v45_v18 = vld [vmem:[%s407_s1 + $0xb8] sm:$0xff]  ;;  %v28_v21 = vld [vmem:[%s407_s1 + $0x30] sm:$0xff] }
   0x6   :  { %200 = vmatprep.subr.bf16.mxu0 %v199_v8  ;;  %228 = vmatprep.subr.bf16.mxu1 %v199_v8  ;;  %v205_v19 = vpack.c.bf16 %v27_v16, %v26_v15  ;;  %v207_v20 = vpack.c.bf16 %v45_v18, %v44_v17  ;;  %v29_v22 = vld [vmem:[%s407_s1 + $0x38] sm:$0xff]  ;;  %v46_v23 = vld [vmem:[%s407_s1 + $0xc0] sm:$0xff]  ;;  %v47_v24 = vld [vmem:[%s407_s1 + $0xc8] sm:$0xff] }
   0x7   :  { %v15_v25 = vld [vmem:[%s408_s0 + $0x8] sm:$0xff]  ;;  %v209_v27 = vpack.c.bf16 %v29_v22, %v28_v21  ;;  %v211_v28 = vpack.c.bf16 %v47_v24, %v46_v23  ;;  %v30_v29 = vld [vmem:[%s407_s1 + $0x40] sm:$0xff]  ;;  %v48_v31 = vld [vmem:[%s407_s1 + $0xd0] sm:$0xff] }
   0x8   :  { %122 = vmatprep.mubr.f32.mxu0 %v15_v25  ;;  %v19_v26 = vld [vmem:[%s408_s0 + $0x28] sm:$0xff]  ;;  %v49_v32 = vld [vmem:[%s407_s1 + $0xd8] sm:$0xff]  ;;  %v32_v35 = vld [vmem:[%s407_s1 + $0x50] sm:$0xff] }
   0x9   :  { %202 = vmatpush3.bf16.msra.mxu0 %v201_v13  ;;  %236 = vmatpush3.bf16.msra.mxu1 %v201_v13  ;;  %v31_v30 = vld [vmem:[%s407_s1 + $0x48] sm:$0xff]  ;;  %v215_v34 = vpack.c.bf16 %v49_v32, %v48_v31  ;;  %v33_v36 = vld [vmem:[%s407_s1 + $0x58] sm:$0xff]  ;;  %v50_v37 = vld [vmem:[%s407_s1 + $0xe0] sm:$0xff] }
   0xa   :  { %204 = vmatprep.subr.bf16.mxu0 %v203_v14  ;;  %229 = vmatprep.subr.bf16.mxu1 %v203_v14  ;;  %v213_v33 = vpack.c.bf16 %v31_v30, %v30_v29  ;;  %v51_v38 = vld [vmem:[%s407_s1 + $0xe8] sm:$0xff]  ;;  %v217_v39 = vpack.c.bf16 %v33_v36, %v32_v35  ;;  %v34_v41 = vld [vmem:[%s407_s1 + $0x60] sm:$0xff]  ;;  %v52_v43 = vld [vmem:[%s407_s1 + $0xf0] sm:$0xff] }
   0xb   :  { %132 = vmatprep.mubr.f32.mxu1 %v19_v26  ;;  %v219_v40 = vpack.c.bf16 %v51_v38, %v50_v37  ;;  %v35_v42 = vld [vmem:[%s407_s1 + $0x68] sm:$0xff]  ;;  %v53_v44 = vld [vmem:[%s407_s1 + $0xf8] sm:$0xff]  ;;  %v36_v47 = vld [vmem:[%s407_s1 + $0x70] sm:$0xff] }
   0xc   :  { %v221_v45 = vpack.c.bf16 %v35_v42, %v34_v41  ;;  %v223_v46 = vpack.c.bf16 %v53_v44, %v52_v43  ;;  %v37_v48 = vld [vmem:[%s407_s1 + $0x78] sm:$0xff]  ;;  %v14_v50 = vld [vmem:[%s408_s0] sm:$0xff]  ;;  %v16_v54 = vld [vmem:[%s408_s0 + $0x10] sm:$0xff] }
   0xd   :  { %206 = vmatpush3.bf16.msra.mxu0 %v205_v19  ;;  %237 = vmatpush3.bf16.msra.mxu1 %v205_v19  ;;  %v225_v49 = vpack.c.bf16 %v37_v48, %v36_v47  ;;  %v18_v51 = vld [vmem:[%s408_s0 + $0x20] sm:$0xff]  ;;  %v17_v52 = vld [vmem:[%s408_s0 + $0x18] sm:$0xff]  ;;  %v20_v55 = vld [vmem:[%s408_s0 + $0x30] sm:$0xff] }
   0xe   :  { %208 = vmatprep.subr.bf16.mxu0 %v207_v20  ;;  %230 = vmatprep.subr.bf16.mxu1 %v207_v20  ;;  %v21_v53 = vld [vmem:[%s408_s0 + $0x38] sm:$0xff]  ;;  %v54_v58 = vld [vmem:[%s409_s2] sm:$0xff]  ;;  %v56_v60 = vld [vmem:[%s409_s2 + $0x10] sm:$0xff] }
   0xf   :  { %v55_v4 = vld [vmem:[%s409_s2 + $0x8] sm:$0xff]  ;;  %v57_v6 = vld [vmem:[%s409_s2 + $0x18] sm:$0xff] }
  0x11   :  { %210 = vmatpush3.bf16.msra.mxu0 %v209_v27  ;;  %238 = vmatpush3.bf16.msra.mxu1 %v209_v27 }
  0x12   :  { %212 = vmatprep.subr.bf16.mxu0 %v211_v28  ;;  %231 = vmatprep.subr.bf16.mxu1 %v211_v28 }
  0x15   :  { %214 = vmatpush3.bf16.msra.mxu0 %v213_v33  ;;  %239 = vmatpush3.bf16.msra.mxu1 %v213_v33 }
  0x16   :  { %216 = vmatprep.subr.bf16.mxu0 %v215_v34  ;;  %232 = vmatprep.subr.bf16.mxu1 %v215_v34 }
  0x19   :  { %218 = vmatpush3.bf16.msra.mxu0 %v217_v39  ;;  %240 = vmatpush3.bf16.msra.mxu1 %v217_v39 }
  0x1a   :  { %220 = vmatprep.subr.bf16.mxu0 %v219_v40  ;;  %233 = vmatprep.subr.bf16.mxu1 %v219_v40 }
  0x1d   :  { %222 = vmatpush3.bf16.msra.mxu0 %v221_v45  ;;  %241 = vmatpush3.bf16.msra.mxu1 %v221_v45 }
  0x1e   :  { %224 = vmatprep.subr.bf16.mxu0 %v223_v46  ;;  %234 = vmatprep.subr.bf16.mxu1 %v223_v46 }
  0x21   :  { %226 = vmatpush3.bf16.msra.mxu0 %v225_v49  ;;  %242 = vmatpush3.bf16.msra.mxu1 %v225_v49 }
  0x24   :  { %123 = vmatmul.mubr.f32.vlgmr.msra.gmra.mrb[0].mxu0 %v14_v50  ;;  %133 = vmatmul.mubr.f32.vlgmr.msra.gmra.mrb[0].mxu1 %v18_v51 }
  0x25   :  { %127 = vmatprep.mubr.f32.mxu0 %v17_v52  ;;  %137 = vmatprep.mubr.f32.mxu1 %v21_v53 }
  0x28   :  { %128 = vmatmul.mubr.f32.gmra.mrb[2].mxu0 %v16_v54  ;;  %138 = vmatmul.mubr.f32.gmra.mrb[2].mxu1 %v20_v55 }
  0xf7   :  { %v183_v56 = vpop.f32.mrb[0].mxu0  ;;  %v189_v57 = vpop.f32.mrb[0].mxu1 }
  0xf8   :  { %v184_v59 = vpop.f32.mrb[1].mxu0  ;;  %v190_v61 = vpop.f32.mrb[1].mxu1 }
  0xf9   :  { %v185_v62 = vadd.f32 %v184_v59, %v183_v56  ;;  %v191_v63 = vadd.f32 %v190_v61, %v189_v57 }
  0xfb   :  { %v125_v0 = vadd.f32 %v185_v62, %v54_v58  ;;  %v135_v1 = vadd.f32 %v191_v63, %v56_v60  ;;  %v186_v2 = vpop.f32.mrb[2].mxu0  ;;  %v192_v3 = vpop.f32.mrb[2].mxu1 }
  0xfc   :  { %v187_v5 = vpop.f32.mrb[3].mxu0  ;;  %v193_v7 = vpop.f32.mrb[3].mxu1 }
  0xfd   :  { %143 = vst [vmem:[%s410_s3] sm:$0xff] %v125_v0  ;;  %145 = vst [vmem:[%s410_s3 + $0x10] sm:$0xff] %v135_v1  ;;  %v188_v8 = vadd.f32 %v187_v5, %v186_v2  ;;  %v194_v9 = vadd.f32 %v193_v7, %v192_v3 }
  0xff   :  { %v130_v10 = vadd.f32 %v188_v8, %v55_v4  ;;  %v140_v11 = vadd.f32 %v194_v9, %v57_v6 }
 0x101   :  { %144 = vst [vmem:[%s410_s3 + $0x8] sm:$0xff] %v130_v10  ;;  %146 = vst [vmem:[%s410_s3 + $0x18] sm:$0xff] %v140_v11 }

</bundles_post_ra>
